<compile_context>
chip_gen: v7x
topology: tpu7x:2x2x1
jax: 0.10.0
libtpu: 0.0.40
codegen_flags: <defaults>
</compile_context>

<pallas_src>
import math

import jax
import jax.numpy as jnp
from jax.experimental import pallas as pl
from jax.experimental.pallas import tpu as pltpu


def _round_up(x, m):
    return ((x + m - 1) // m) * m


def _device_kind():
    try:
        return jax.devices()[0].device_kind.lower()
    except Exception:
        return ""


def _vmem_capacity_bytes():
    kind = _device_kind()
    if "v7" in kind or "7x" in kind:
        return 64 << 20                       # v7x: 64 MiB per TensorCore
    try:
        return int(pltpu.get_tpu_info().vmem_capacity_bytes)
    except Exception:
        return 128 << 20                      # v5e / v6e physical VMEM


def _batch_tile_cap():
    # v5e MXU is 4x128^2 -> tm=128 already fills M; v6e/v7x are 2x256^2 -> 256.
    return 128 if "v5" in _device_kind() else 256


def _const_spec(shape, index_map):
    """BlockSpec for a constant-index operand, single-buffered when supported."""
    try:
        return pl.BlockSpec(shape, index_map, pipeline_mode=pl.Buffered(1))
    except Exception:  # older jax: no pipeline_mode / pl.Buffered
        return pl.BlockSpec(shape, index_map)


# ---------------------------------------------------------------------------
# Kernel 1: resident-weight path (multiple batch tiles; weights stay in VMEM)
# ---------------------------------------------------------------------------
def _mlp_resident_kernel(x_ref, w1_ref, b1_ref, w2_ref, b2_ref, out_ref):
    # x: (tm, Fp) bf16 ; w1/w2: (Fp, Fp) bf16 pre-transposed to (in, out);
    # b1/b2: (1, Fp) f32 ; out: (tm, Fp) f32.
    h = jnp.dot(x_ref[...], w1_ref[...], preferred_element_type=jnp.float32)
    h = jnp.maximum(h + b1_ref[...], 0.0).astype(jnp.bfloat16)
    y = jnp.dot(h, w2_ref[...], preferred_element_type=jnp.float32)
    out_ref[...] = (y + b2_ref[...]).astype(out_ref.dtype)


# ---------------------------------------------------------------------------
# Kernel 2: weight-streaming path (single batch tile / very large feat_dim).
# Grid axis k runs over 2*kt chunks of [W1^T ; W2^T]:
#   phase 1 (k < kt):  h += x[:, chunk k] @ W1^T[chunk k, :]
#   phase 2 (k >= kt): out += relu(h[:, chunk k-kt] + b1[chunk]) @ W2^T[chunk, :]
# so every (tk, Fp) weight DMA overlaps the previous chunk's MXU work.
# ---------------------------------------------------------------------------
def _make_stream_kernel(kt, tk):
    def kernel(x_ref, w_ref, b1_ref, b2_ref, out_ref, h_ref):
        k = pl.program_id(1)

        @pl.when(k == 0)
        def _init_h():
            h_ref[...] = jnp.zeros_like(h_ref)

        @pl.when(k < kt)
        def _phase1():
            part = jnp.dot(x_ref[...], w_ref[...],
                           preferred_element_type=jnp.float32)       # (tm, Fp)
            for c in range(kt):                                       # static, lane-aligned
                h_ref[c] += part[:, c * tk:(c + 1) * tk]

        @pl.when(k == kt)
        def _init_out():
            out_ref[...] = jnp.broadcast_to(
                b2_ref[...], out_ref.shape).astype(out_ref.dtype)

        @pl.when(k >= kt)
        def _phase2():
            hk = jnp.maximum(h_ref[k - kt] + b1_ref[...], 0.0).astype(jnp.bfloat16)
            out_ref[...] += jnp.dot(hk, w_ref[...],
                                    preferred_element_type=jnp.float32)

    return kernel


# ---------------------------------------------------------------------------
# Wrapper: fused  Linear -> ReLU -> Linear  (the ss_module MLP)
# ---------------------------------------------------------------------------
def ss_mlp(x_flat, wcat, b1_p, b2_p):
    """y = relu(x @ W1^T + b1) @ W2^T + b2.

    `wcat` = [W1^T ; W2^T], shape (2*Fp, Fp), bf16, zero-padded so that
    feat_dim -> Fp (multiple of 128). b1_p / b2_p are (1, Fp) f32.
    Returns f32 (n, feat_dim).
    """
    n, f = x_flat.shape
    f_pad = wcat.shape[1]
    assert wcat.shape[0] == 2 * f_pad and f <= f_pad

    # Batch tile: multiple of 16 (bf16 sublane packing); batch is only padded
    # up to the next multiple of 16 (never a full tile).
    n16 = _round_up(max(n, 1), 16)
    tm = min(_batch_tile_cap(), n16)
    grid_m = pl.cdiv(n16, tm)

    if n16 != n or f_pad != f:
        x_p = jnp.pad(x_flat, ((0, n16 - n), (0, f_pad - f)))
    else:
        x_p = x_flat
    x_p = x_p.astype(jnp.bfloat16)

    hard_cap = min((_vmem_capacity_bytes() * 3) // 4, 96 << 20)   # 48 MiB v7x, 96 MiB v5e/v6e

    # VMEM footprint of the resident-weight path (weights single-buffered).
    resident_est = (
        2 * f_pad * f_pad * 2          # W1 + W2 blocks (Buffered(1))
        + 2 * f_pad * 4                # biases
        + 2 * tm * f_pad * 2           # x tile, double-buffered
        + 2 * tm * f_pad * 4           # out tile, double-buffered
        + 2 * tm * f_pad * 4           # f32 intermediate + result staging
    )
    use_streaming = (grid_m == 1) or (resident_est + (8 << 20) > hard_cap)

    if not use_streaming:
        vmem_limit = int(max(32 << 20, min(hard_cap, resident_est + (8 << 20))))
        w1_spec = _const_spec((f_pad, f_pad), lambda i: (0, 0))   # rows [0, Fp)      = W1^T
        w2_spec = _const_spec((f_pad, f_pad), lambda i: (1, 0))   # rows [Fp, 2*Fp)   = W2^T
        b_spec = _const_spec((1, f_pad), lambda i: (0, 0))
        out = pl.pallas_call(
            _mlp_resident_kernel,
            out_shape=jax.ShapeDtypeStruct((n16, f_pad), jnp.float32),
            grid=(grid_m,),
            in_specs=[pl.BlockSpec((tm, f_pad), lambda i: (i, 0)),
                      w1_spec, b_spec, w2_spec, b_spec],
            out_specs=pl.BlockSpec((tm, f_pad), lambda i: (i, 0)),
            compiler_params=pltpu.CompilerParams(
                dimension_semantics=("parallel",),   # batch tiles shard across TCs
                vmem_limit_bytes=vmem_limit),
        )(x_p, wcat, b1_p, wcat, b2_p)
    else:
        tk = next(c for c in (512, 384, 256, 128) if f_pad % c == 0)
        kt = f_pad // tk
        stream_est = (
            2 * tk * f_pad * 2          # streamed weight chunk, double-buffered
            + 2 * tm * tk * 2           # x chunk, double-buffered
            + 2 * tm * f_pad * 4        # resident out accumulator
            + tm * f_pad * 4            # h scratch (kt, tm, tk) f32
            + tm * f_pad * 4            # matmul result staging
            + 2 * tk * 4 + f_pad * 4    # biases
        )
        vmem_limit = int(max(32 << 20, min(hard_cap, stream_est + (8 << 20))))
        assert stream_est + (4 << 20) <= vmem_limit, (
            f"feat_dim={f} (padded {f_pad}) exceeds the VMEM budget "
            f"({vmem_limit >> 20} MiB); add N-tiling to ss_mlp.")

        out = pl.pallas_call(
            _make_stream_kernel(kt, tk),
            out_shape=jax.ShapeDtypeStruct((n16, f_pad), jnp.float32),
            grid=(grid_m, 2 * kt),
            in_specs=[
                # x chunk k in phase 1; parked on the last chunk in phase 2 (no re-DMA)
                pl.BlockSpec((tm, tk), lambda i, k: (i, jnp.minimum(k, kt - 1))),
                # [W1^T ; W2^T] chunk: rows [k*tk, (k+1)*tk)
                pl.BlockSpec((tk, f_pad), lambda i, k: (k, 0)),
                # b1 chunk: parked on chunk 0 in phase 1, walks chunks in phase 2
                pl.BlockSpec((1, tk), lambda i, k: (0, jnp.maximum(k - kt, 0))),
                _const_spec((1, f_pad), lambda i, k: (0, 0)),
            ],
            out_specs=pl.BlockSpec((tm, f_pad), lambda i, k: (i, 0)),
            scratch_shapes=[pltpu.VMEM((kt, tm, tk), jnp.float32)],
            compiler_params=pltpu.CompilerParams(
                dimension_semantics=("parallel", "arbitrary"),
                vmem_limit_bytes=vmem_limit),
        )(x_p, wcat, b1_p, b2_p)

    if n16 != n or f_pad != f:
        out = out[:n, :f]
    return out


# ---------------------------------------------------------------------------
# JAX re-implementation of SSWrapper4SSKD (forward / post_forward semantics)
# ---------------------------------------------------------------------------
class SSWrapper4SSKD:
    def __init__(self, feat_dim, key, is_teacher=False):
        self.is_teacher = is_teacher
        self.feat_dim = feat_dim
        self.f_pad = _round_up(max(feat_dim, 128), 128)   # lane-dense last dim

        # nn.Linear default init: U(-1/sqrt(fan_in), 1/sqrt(fan_in)), weight (out, in).
        k1, k2, k3, k4 = jax.random.split(key, 4)
        bound = 1.0 / math.sqrt(feat_dim)
        self.w1 = jax.random.uniform(k1, (feat_dim, feat_dim), jnp.float32, -bound, bound)
        self.b1 = jax.random.uniform(k2, (feat_dim,), jnp.float32, -bound, bound)
        self.w2 = jax.random.uniform(k3, (feat_dim, feat_dim), jnp.float32, -bound, bound)
        self.b2 = jax.random.uniform(k4, (feat_dim,), jnp.float32, -bound, bound)

        # Kernel-ready weights built ONCE: transpose to (in, out), zero-pad to
        # (Fp, Fp), stack [W1^T ; W2^T], cast to bf16. Biases stay f32.
        pad = self.f_pad - feat_dim
        w1_t = jnp.pad(self.w1.T, ((0, pad), (0, pad)))
        w2_t = jnp.pad(self.w2.T, ((0, pad), (0, pad)))
        self.wcat = jnp.concatenate([w1_t, w2_t], axis=0).astype(jnp.bfloat16)
        self.b1_p = jnp.pad(self.b1, (0, pad)).reshape(1, -1)
        self.b2_p = jnp.pad(self.b2, (0, pad)).reshape(1, -1)

    def forward(self, x):
        # TODO(synk): the wrapped teacher/student backbone `model` is an external
        # module not owned by this wrapper; identity stands in for self.model(x).
        return x

    def post_forward(self, feat):
        # torch.flatten(feat, 1): (N, C, H, W) -> (N, C*H*W), then ss_module.
        flat = feat.reshape(feat.shape[0], -1)
        return ss_mlp(flat, self.wcat, self.b1_p, self.b2_p)


if __name__ == "__main__":
    key = jax.random.PRNGKey(0)
    k_in, k_feat, k_params, k_big = jax.random.split(key, 4)

    # Small shapes: wrapped-model input x is NCHW (2, 4, 16, 16); captured
    # intermediate feature (io_dict entry) is (2, 2, 4, 4) -> feat_dim = 32.
    x = jax.random.normal(k_in, (2, 4, 16, 16), jnp.float32)
    feat = jax.random.normal(k_feat, (2, 2, 4, 4), jnp.float32)
    feat_dim = 2 * 4 * 4  # 32

    wrapper = SSWrapper4SSKD(feat_dim=feat_dim, key=k_params, is_teacher=False)

    def ref_mixed(flat):
        # Reference matching the kernel's bf16-weight / f32-accumulate numerics.
        w1b = wrapper.wcat[:feat_dim, :feat_dim].astype(jnp.float32)
        w2b = wrapper.wcat[wrapper.f_pad:wrapper.f_pad + feat_dim, :feat_dim].astype(jnp.float32)
        xb = flat.astype(jnp.bfloat16).astype(jnp.float32)
        h = jnp.maximum(xb @ w1b + wrapper.b1, 0.0)
        return h.astype(jnp.bfloat16).astype(jnp.float32) @ w2b + wrapper.b2

    def ref_f32(flat):
        h = jnp.maximum(flat @ wrapper.w1.T + wrapper.b1, 0.0)
        return h @ wrapper.w2.T + wrapper.b2

    _ = wrapper.forward(x)                    # passthrough of wrapped model
    out_small = wrapper.post_forward(feat)    # single batch tile -> weight-streaming path
    jax.block_until_ready(out_small)
    flat_small = feat.reshape(feat.shape[0], -1)
    assert out_small.shape == (2, feat_dim) and out_small.dtype == jnp.float32
    assert jnp.allclose(out_small, ref_mixed(flat_small), atol=1e-2, rtol=1e-2)
    assert jnp.allclose(out_small, ref_f32(flat_small), atol=5e-2, rtol=5e-2)

    # Larger batch exercises the multi-tile resident-weight path (ragged last tile).
    feat_big = jax.random.normal(k_big, (300, 2, 4, 4), jnp.float32)
    out_big = wrapper.post_forward(feat_big)
    jax.block_until_ready(out_big)
    flat_big = feat_big.reshape(300, -1)
    assert out_big.shape == (300, feat_dim)
    assert jnp.allclose(out_big, ref_mixed(flat_big), atol=1e-2, rtol=1e-2)
    assert jnp.allclose(out_big, ref_f32(flat_big), atol=5e-2, rtol=5e-2)

    print("KERNEL_OK")
</pallas_src>

<mosaic_0001>
module attributes {stable_mosaic.version = 11 : i64} {
  func.func @kernel(%arg0: i32, %arg1: i32, %arg2: memref<16x128xbf16, #tpu.memory_space<vmem>>, %arg3: memref<128x128xbf16, #tpu.memory_space<vmem>>, %arg4: memref<1x128xf32, #tpu.memory_space<vmem>>, %arg5: memref<1x128xf32, #tpu.memory_space<vmem>>, %arg6: memref<16x128xf32, #tpu.memory_space<vmem>>, %arg7: memref<1x16x128xf32, #tpu.memory_space<vmem>>) attributes {dimension_semantics = [#tpu.dimension_semantics<parallel>, #tpu.dimension_semantics<arbitrary>], iteration_bounds = array<i64: 1, 2>, scalar_prefetch = 0 : i64, scratch_operands = 1 : i64, tpu.core_type = #tpu.core_type<tc>, window_params = [{transform_indices = @transform_0, window_bounds = array<i64: 16, 128>}, {transform_indices = @transform_1, window_bounds = array<i64: 128, 128>}, {transform_indices = @transform_2, window_bounds = array<i64: 1, 128>}, {pipeline_mode = #tpu.pipeline_mode<synchronous>, transform_indices = @transform_3, window_bounds = array<i64: 1, 128>}, {transform_indices = @transform_4, window_bounds = array<i64: 16, 128>}]} {
    %c0_i32 = arith.constant 0 : i32
    %0 = arith.cmpi eq, %arg1, %c0_i32 : i32
    %1 = arith.extui %0 : i1 to i32
    %c0_i32_0 = arith.constant 0 : i32
    %2 = arith.cmpi ne, %1, %c0_i32_0 : i32
    scf.if %2 {
      %cst = arith.constant 0.000000e+00 : f32
      %12 = vector.broadcast %cst : f32 to vector<1x16x128xf32>
      %c0 = arith.constant 0 : index
      %c0_6 = arith.constant 0 : index
      %c0_7 = arith.constant 0 : index
      %13 = vector.load %arg7[%c0, %c0_6, %c0_7] : memref<1x16x128xf32, #tpu.memory_space<vmem>>, vector<1x16x128xf32>
      tpu.vector_store %arg7[%c0, %c0_6, %c0_7], %12 {strides = array<i32>} : memref<1x16x128xf32, #tpu.memory_space<vmem>>, vector<1x16x128xf32>,
    } else {
    }
    %c1_i32 = arith.constant 1 : i32
    %3 = arith.cmpi slt, %arg1, %c1_i32 : i32
    %4 = arith.extui %3 : i1 to i32
    %c0_i32_1 = arith.constant 0 : i32
    %5 = arith.cmpi ne, %4, %c0_i32_1 : i32
    scf.if %5 {
      %c0 = arith.constant 0 : index
      %c0_6 = arith.constant 0 : index
      %12 = vector.load %arg2[%c0, %c0_6] : memref<16x128xbf16, #tpu.memory_space<vmem>>, vector<16x128xbf16>
      %c0_7 = arith.constant 0 : index
      %c0_8 = arith.constant 0 : index
      %13 = vector.load %arg3[%c0_7, %c0_8] : memref<128x128xbf16, #tpu.memory_space<vmem>>, vector<128x128xbf16>
      %cst = arith.constant dense<0.000000e+00> : vector<16x128xf32>
      %14 = tpu.matmul %12, %13, %cst {dimension_numbers = #tpu.dot_dimension_numbers<[1], [0], [0], [1], [0, 0, 1, 1], [], []>} : vector<16x128xbf16>, vector<128x128xbf16>, vector<16x128xf32> -> vector<16x128xf32>
      %c0_9 = arith.constant 0 : index
      %c0_10 = arith.constant 0 : index
      %c0_11 = arith.constant 0 : index
      %15 = vector.load %arg7[%c0_9, %c0_10, %c0_11] : memref<1x16x128xf32, #tpu.memory_space<vmem>>, vector<1x16x128xf32>
      %16 = vector.shape_cast %15 : vector<1x16x128xf32> to vector<16x128xf32>
      %17 = arith.addf %16, %14 : vector<16x128xf32>
      %c0_12 = arith.constant 0 : index
      %c0_13 = arith.constant 0 : index
      %c0_14 = arith.constant 0 : index
      %18 = vector.load %arg7[%c0_12, %c0_13, %c0_14] : memref<1x16x128xf32, #tpu.memory_space<vmem>>, vector<1x16x128xf32>
      %19 = vector.shape_cast %18 : vector<1x16x128xf32> to vector<16x128xf32>
      %20 = vector.shape_cast %17 : vector<16x128xf32> to vector<1x16x128xf32>
      tpu.vector_store %arg7[%c0_12, %c0_13, %c0_14], %20 {strides = array<i32>} : memref<1x16x128xf32, #tpu.memory_space<vmem>>, vector<1x16x128xf32>,
    } else {
    }
    %c1_i32_2 = arith.constant 1 : i32
    %6 = arith.cmpi eq, %arg1, %c1_i32_2 : i32
    %7 = arith.extui %6 : i1 to i32
    %c0_i32_3 = arith.constant 0 : i32
    %8 = arith.cmpi ne, %7, %c0_i32_3 : i32
    scf.if %8 {
      %c0 = arith.constant 0 : index
      %c0_6 = arith.constant 0 : index
      %12 = vector.load %arg5[%c0, %c0_6] : memref<1x128xf32, #tpu.memory_space<vmem>>, vector<1x128xf32>
      %13 = vector.shape_cast %12 : vector<1x128xf32> to vector<1x128xf32>
      %14 = vector.broadcast %13 : vector<1x128xf32> to vector<16x128xf32>
      %c0_7 = arith.constant 0 : index
      %c0_8 = arith.constant 0 : index
      %15 = vector.load %arg6[%c0_7, %c0_8] : memref<16x128xf32, #tpu.memory_space<vmem>>, vector<16x128xf32>
      tpu.vector_store %arg6[%c0_7, %c0_8], %14 {strides = array<i32>} : memref<16x128xf32, #tpu.memory_space<vmem>>, vector<16x128xf32>,
    } else {
    }
    %c1_i32_4 = arith.constant 1 : i32
    %9 = arith.cmpi sge, %arg1, %c1_i32_4 : i32
    %10 = arith.extui %9 : i1 to i32
    %c0_i32_5 = arith.constant 0 : i32
    %11 = arith.cmpi ne, %10, %c0_i32_5 : i32
    scf.if %11 {
      %c1_i32_6 = arith.constant 1 : i32
      %12 = arith.subi %arg1, %c1_i32_6 : i32
      %13 = arith.index_cast %12 : i32 to index
      %c0 = arith.constant 0 : index
      %c0_7 = arith.constant 0 : index
      %14 = vector.load %arg7[%13, %c0, %c0_7] : memref<1x16x128xf32, #tpu.memory_space<vmem>>, vector<1x16x128xf32>
      %15 = vector.shape_cast %14 : vector<1x16x128xf32> to vector<16x128xf32>
      %c0_8 = arith.constant 0 : index
      %c0_9 = arith.constant 0 : index
      %16 = vector.load %arg4[%c0_8, %c0_9] : memref<1x128xf32, #tpu.memory_space<vmem>>, vector<1x128xf32>
      %17 = vector.broadcast %16 : vector<1x128xf32> to vector<16x128xf32>
      %18 = arith.addf %15, %17 : vector<16x128xf32>
      %cst = arith.constant 0.000000e+00 : f32
      %19 = vector.broadcast %cst : f32 to vector<16x128xf32>
      %20 = arith.maximumf %18, %19 : vector<16x128xf32>
      %21 = arith.truncf %20 : vector<16x128xf32> to vector<16x128xbf16>
      %c0_10 = arith.constant 0 : index
      %c0_11 = arith.constant 0 : index
      %22 = vector.load %arg6[%c0_10, %c0_11] : memref<16x128xf32, #tpu.memory_space<vmem>>, vector<16x128xf32>
      %c0_12 = arith.constant 0 : index
      %c0_13 = arith.constant 0 : index
      %23 = vector.load %arg3[%c0_12, %c0_13] : memref<128x128xbf16, #tpu.memory_space<vmem>>, vector<128x128xbf16>
      %cst_14 = arith.constant dense<0.000000e+00> : vector<16x128xf32>
      %24 = tpu.matmul %21, %23, %cst_14 {dimension_numbers = #tpu.dot_dimension_numbers<[1], [0], [0], [1], [0, 0, 1, 1], [], []>} : vector<16x128xbf16>, vector<128x128xbf16>, vector<16x128xf32> -> vector<16x128xf32>
      %25 = arith.addf %22, %24 : vector<16x128xf32>
      %c0_15 = arith.constant 0 : index
      %c0_16 = arith.constant 0 : index
      %26 = vector.load %arg6[%c0_15, %c0_16] : memref<16x128xf32, #tpu.memory_space<vmem>>, vector<16x128xf32>
      tpu.vector_store %arg6[%c0_15, %c0_16], %25 {strides = array<i32>} : memref<16x128xf32, #tpu.memory_space<vmem>>, vector<16x128xf32>,
    } else {
    }
    return
  }
  func.func @transform_0(%arg0: i32, %arg1: i32) -> (i32, i32) {
    %c0_i32 = arith.constant 0 : i32
    %0 = arith.minsi %arg1, %c0_i32 : i32
    %c0_i32_0 = arith.constant 0 : i32
    return %arg0, %0 : i32, i32
  }
  func.func @transform_1(%arg0: i32, %arg1: i32) -> (i32, i32) {
    %c0_i32 = arith.constant 0 : i32
    %c0_i32_0 = arith.constant 0 : i32
    return %arg1, %c0_i32 : i32, i32
  }
  func.func @transform_2(%arg0: i32, %arg1: i32) -> (i32, i32) {
    %c1_i32 = arith.constant 1 : i32
    %0 = arith.subi %arg1, %c1_i32 : i32
    %c0_i32 = arith.constant 0 : i32
    %1 = arith.maxsi %0, %c0_i32 : i32
    %c0_i32_0 = arith.constant 0 : i32
    %c0_i32_1 = arith.constant 0 : i32
    return %c0_i32_0, %1 : i32, i32
  }
  func.func @transform_3(%arg0: i32, %arg1: i32) -> (i32, i32) {
    %c0_i32 = arith.constant 0 : i32
    %c0_i32_0 = arith.constant 0 : i32
    %c0_i32_1 = arith.constant 0 : i32
    return %c0_i32, %c0_i32_0 : i32, i32
  }
  func.func @transform_4(%arg0: i32, %arg1: i32) -> (i32, i32) {
    %c0_i32 = arith.constant 0 : i32
    %c0_i32_0 = arith.constant 0 : i32
    return %arg0, %c0_i32 : i32, i32
  }
}

</mosaic_0001>

<bundles_post_ra>
// kernel: tpu_custom_call.1
= control target key start
LH: loop header
LB: loop body
LE: loop exit
PB: predicated region body
PF: predicated region fallthrough
CT: control target
= control target key end

     0   :  { %9 = vsyncpa [#allocation4], 0  ;;  %s1374_s0 = inlined_call_operand.hbm [shape: bf16[16,128], index: 0, kind: input, shape index: {}]   ;;  %s1375_s1 = inlined_call_operand.hbm [shape: bf16[256,128], index: 1, kind: input, shape index: {}]   ;;  %s1376_s2 = inlined_call_operand.vmem [shape: f32[1,128], index: 2, kind: input, shape index: {}]   ;;  %s1377_s3 = inlined_call_operand.vmem [shape: f32[1,128], index: 3, kind: input, shape index: {}]   ;;  %s1378_s4 = inlined_call_operand.hbm [shape: f32[16,128], index: 4, kind: output, shape index: {}]  }
   0x1   :  { %11 = vsyncpa [#allocation4 + $0x1], 0 }
   0x2   :  { %12 = vsyncpa [#allocation7], 0 }
   0x3   :  { %14 = vsyncpa [#allocation7 + $0x1], 0 }
   0x4   :  { %15 = vsyncpa [#allocation5], 0  ;;  %s1122_s15 = smov 0   ;;  %s1124_s16 = smov 0  }
   0x5   :  { %s1126_s17 = smov 0   ;;  %s1128_s18 = smov 0  }
   0x6   :  { %s1130_s19 = smov 0   ;;  %s1132_s20 = smov 0  }
   0x7   :  { %s1134_s21 = smov 0   ;;  %s1136_s22 = smov 0  }
   0x8 LB: > { %s694_s23 = sadd.s32 4294967295, %s1083_s22   ;;  %s30_s24 = sadd.s32 1, %s1079_s21  ;;  %s1083_s22 = sphi %s1136_s22, %s21_s22   ;;  %s1079_s21 = sphi %s1134_s21, %s1403_s21   ;;  %s1075_s20 = sphi %s1132_s20, %s1402_s20   ;;  %s1071_s19 = sphi %s1130_s19, %s1364_s19   ;;  %s1067_s18 = sphi %s1128_s18, %s1401_s18   ;;  %s1063_s17 = sphi %s1126_s17, %s1400_s17   ;;  %s1059_s16 = sphi %s1124_s16, %s1399_s16   ;;  %s1055_s15 = sphi %s1122_s15, %s1398_s15  }
   0x9   : > { %p31_p0 = scmp.ge.s32.totalorder %s30_s24, 2  ;;  %p1052_p1 = scmp.ne.s32.totalorder %s1071_s19, 0 }
   0xa   : > { %p1380_p2 = scmp.eq.s32.totalorder %s1083_s22, 0  ;;  %p59_p3 = scmp.ne.s32.totalorder %s1071_s19, %s1067_s18 }
   0xb   : > { %s1405_s24 = smov (%p31_p0, %s30_s24), 0  ;;  %p1169_p4 = scmp.eq.s32.totalorder %s694_s23, 0 }
   0xc   : > { %p55_p5 = por %p1052_p1, %p1380_p2  ;;  %p1379_p7 = scmp.lt.s32.totalorder %s1083_s22, 2 }
   0xd   : > { %s1385_s25 = scalar_select %p1169_p4, 1, 0 }
   0xe   : > { %p1177_p6 = por %p1169_p4, %p59_p3  ;;  %s1085_s27 = smov [#allocation3]  }
   0xf   : > { %s205_s28 = sshll.u32 %s1085_s27, 4  ;;  %p1184_p8 = pnand %p1379_p7, %p55_p5  ;;  %s206_s28 = int_to_ptr.vmem [resolvable:$true] %s205_s28 }
  0x10   : > { %s1386_s26 = scalar_select %p1177_p6, 1, 0 }
  0x11   : > { %s1387_s29 = scalar_select %p1184_p8, 1, 0 }
  0x12   : > { %s918_s6 = scalar_lea.hbm %s1374_s0, 128  ;;  %p920_p10 = pneg %p1184_p8 }
  0x13   : > { %p919_p9 = scmp.ne.s32.totalorder %s1374_s0, %s918_s6  ;;  %p925_p13 = scmp.lt.u32.totalorder %s918_s6, %s918_s6 }
  0x14   : > { %p927_p0 = scmp.lt.u32.totalorder %s918_s6, %s1374_s0 }
  0x15   : > { %p921_p11 = pnand %p920_p10, %p919_p9 }
  0x16   : > { %p928_p1 = por %p927_p0, %p925_p13 }
  0x17   : > { %p922_p12 = pneg %p921_p11 }
  0x19   : > { %p929_p3 = pnand %p928_p1, %p922_p12 }
  0x1b   : > { %932 = shalt.err (!%p929_p3)
}
  0x1c   : > { %s933_s11 = scalar_lea.vmem %s206_s28, 128  ;;  %s940_s12 = scalar_lea.vmem %s206_s28, 256 }
  0x1d   : > { %p934_p5 = scmp.ne.s32.totalorder %s206_s28, %s933_s11  ;;  %p941_p6 = scmp.lt.s32.totalorder %s206_s28, %s206_s28 }
  0x1e   : > { %p942_p4 = scmp.lt.s32.totalorder %s940_s12, %s933_s11 }
  0x1f   : > { %p936_p7 = pnand %p934_p5, %p920_p10 }
  0x20   : > { %p943_p8 = por %p942_p4, %p941_p6 }
  0x21   : > { %p937_p2 = pneg %p936_p7 }
  0x23   : > { %p944_p9 = pnand %p943_p8, %p937_p2 }
  0x25   : > { %947 = shalt.err (!%p944_p9)
}
  0x26   : > { %s1086_s13 = smov 64   ;;  %s1087_s14 = smov 4  }
  0x27   : > { %p1388_p4 = scmp.ne.s32.totalorder %s1387_s29, 0  ;;  %p704_p2 = scmp.ge.s32.totalorder %s1083_s22, 1 }
  0x28   : > { %p246_p6 = scmp.lt.s32.totalorder %s1083_s22, 3  ;;  %s69_s5 = ssub.s32 %s1079_s21, %s1405_s24 }
  0x29   : > { %812 = dma.hbm_to_vmem [thread:$0]  (!%p1388_p4), %s1374_s0, 128, %s206_s28, [#allocation4], %s1086_s13, %s1086_s13, %s1087_s14  }
  0x2a   : > { %p1209_p7 = pnand %p704_p2, %p246_p6  ;;  %p70_p8 = scmp.eq.s32.totalorder %s69_s5, 0 }
  0x2b   : > { %s72_s6 = sadd.s32 1, %s1063_s17  ;;  %p79_p10 = scmp.ne.s32.totalorder %s1063_s17, %s1059_s16 }
  0x2c   : > { %p85_p11 = scmp.ne.s32.totalorder %s1059_s16, %s1055_s15  ;;  %p1390_p12 = scmp.eq.s32.totalorder %s1083_s22, 0 }
  0x2d   : > { %s1221_s29 = scalar_select %p70_p8, %s1063_s17, %s72_s6  }
  0x2e   : > { %p81_p13 = por %p79_p10, %p1390_p12  ;;  %p1391_p0 = scmp.ne.s32.totalorder %s1385_s25, 0 }
  0x2f   : > { %s215_s28 = sand.u32 1, %s1063_s17   ;;  %s742_s8 = sshll.u32 %s1079_s21, 10 }
  0x30   : > { %p1227_p1 = por %p85_p11, %p1391_p0  ;;  %s701_s9 = sshll.u32 %s215_s28, 6 }
  0x31   : > { %s1236_s12 = scalar_lea.hbm %s1375_s1, %s742_s8  ;;  %s219_s15 = scalar_lea.vmem [#allocation6], %s701_s9 }
  0x32   : > { %s1392_s7 = scalar_select %p1227_p1, 1, 0 }
  0x33   : > { %s226_s18 = sshll.u32 %s219_s15, 4  ;;  %p1393_p3 = scmp.lt.s32.totalorder %s1083_s22, 2  ;;  %s1244_s18 = int_to_ptr.vmem [resolvable:$true] %s226_s18 }
  0x34   : > { %s1246_s27 = scalar_lea.sflag [#allocation7], %s215_s28  ;;  %s948_s5 = scalar_lea.hbm %s1236_s12, 1024 }
  0x35   : > { %p1240_p5 = pnand %p1393_p3, %p81_p13  ;;  %p949_p9 = scmp.ne.s32.totalorder %s1236_s12, %s948_s5 }
  0x36   : > { %s953_s9 = scalar_lea.hbm %s1375_s1, 2048  ;;  %p954_p8 = scmp.lt.u32.totalorder %s1236_s12, %s1375_s1 }
  0x37   : > { %p950_p4 = pneg %p1240_p5  ;;  %p955_p10 = scmp.lt.u32.totalorder %s953_s9, %s948_s5 }
  0x38   : > { %p957_p12 = scmp.lt.u32.totalorder %s948_s5, %s1236_s12 }
  0x39   : > { %p951_p2 = pnand %p950_p4, %p949_p9  ;;  %p956_p11 = por %p955_p10, %p954_p8 }
  0x3b   : > { %p952_p6 = pneg %p951_p2  ;;  %p958_p13 = por %p957_p12, %p956_p11 }
  0x3d   : > { %p959_p0 = pnand %p958_p13, %p952_p6 }
  0x3f   : > { %962 = shalt.err (!%p959_p0)
}
  0x40   : > { %s963_s28 = scalar_lea.vmem %s1244_s18, 1024  ;;  %s1088_s15 = smov [#allocation6]  }
  0x41   : > { %p964_p3 = scmp.ne.s32.totalorder %s1244_s18, %s963_s28  ;;  %s968_s6 = sshll.u32 %s1088_s15, 4  ;;  %s969_s6 = int_to_ptr.vmem [resolvable:$false] %s968_s6 }
  0x42   : > { %s970_s8 = scalar_lea.vmem %s969_s6, 2048  ;;  %p971_p1 = scmp.lt.s32.totalorder %s1244_s18, %s969_s6 }
  0x43   : > { %p966_p9 = pnand %p964_p3, %p950_p4  ;;  %p972_p8 = scmp.lt.s32.totalorder %s970_s8, %s963_s28 }
  0x45   : > { %p967_p2 = pneg %p966_p9  ;;  %p973_p10 = por %p972_p8, %p971_p1 }
  0x47   : > { %p974_p11 = pnand %p973_p10, %p967_p2 }
  0x49   : > { %977 = shalt.err (!%p974_p11)
}
  0x4a   : > { %815 = dma.hbm_to_vmem [thread:$0]  (!%p1240_p5), %s1236_s12, 1024, %s1244_s18, %s1246_s27, %s1086_s13, %s1086_s13, %s1087_s14  }
  0x4b   : > { %250 = sbr.rel (%p1209_p7) target bundleno = 633 (0x279), region = 36  ;;  %s252_s5 = sand.u32 (!%p1209_p7), 1, %s1071_s19  }
  0x4c   : > { %s1280_s9 = sshll.u32 (!%p1209_p7), %s252_s5, 3  ;;  %s253_s10 = scalar_lea.sflag (!%p1209_p7), [#allocation4], %s252_s5 }
  0x4d   : > { %s256_s11 = scalar_lea.vmem (!%p1209_p7), [#allocation3], %s1280_s9  ;;  %p1395_p1 = scmp.ne.s32.totalorder (!%p1209_p7), %s1386_s26, 0 }
  0x52   : > { %1041 = dma.done.wait (%p1395_p1), %s253_s10, 128  }
  0x53   : > { %1043 = vsyncadd (%p1395_p1), %s253_s10, 4294967168  ;;  %s261_s25 = sand.u32 1, %s1059_s16   ;;  %p1396_p7 = scmp.ne.s32.totalorder %s1392_s7, 0 }
  0x54   : > { %s706_s13 = sshll.u32 %s261_s25, 6  ;;  %s262_s14 = scalar_lea.sflag [#allocation7], %s261_s25 }
  0x55   : > { %s1288_s30 = scalar_lea.vmem [#allocation6], %s706_s13 }
  0x56   : > { %1045 = dma.done.wait (%p1396_p7), %s262_s14, 1024  }
  0x57   : > { %1047 = vsyncadd (%p1396_p7), %s262_s14, 4294966272  ;;  %p713_p5 = scmp.ne.s32.totalorder %s1075_s20, 0 }
  0x58   : > { %v1089_v0 = vmov (!%p713_p5), 0.0  }
  0x59   : > { %314 = sbr.rel (%p713_p5) target bundleno = 96 (0x60), region = 48  ;;  %315 = vst [vmem:[#allocation2] sm:$0xff] (!%p713_p5), %v1089_v0  ;;  %316 = vst [vmem:[#allocation2 + $0x8] sm:$0xff] (!%p713_p5), %v1089_v0 }
  0x60 PF: > { %p714_p4 = scmp.ge.s32.totalorder %s1075_s20, 1 }
  0x61   : > { %v901_v1 = vld [vmem:[%s1288_s30] sm:$0xff] (!%p714_p4)   ;;  %v1090_v2 = vmov (!%p714_p4), 0.0   ;;  %v902_v3 = vld [vmem:[%s1288_s30 + $0x8] sm:$0xff] (!%p714_p4)   ;;  %vm1091_vm0 = vmmov (!%p714_p4), 0   ;;  %v903_v4 = vld [vmem:[%s1288_s30 + $0x10] sm:$0xff] (!%p714_p4)  }
  0x62   : > { %320 = sbr.rel (%p714_p4) target bundleno = 347 (0x15b), region = 52  ;;  %761 = vmatprep.subr.bf16.mxu0 (!%p714_p4), %v1090_v2  ;;  %777 = vmatprep.mubr.msk.bf16.mxu0 (!%p714_p4), %vm1091_vm0, %v1090_v2  ;;  %v904_v5 = vld [vmem:[%s1288_s30 + $0x18] sm:$0xff] (!%p714_p4)   ;;  %v905_v6 = vld [vmem:[%s1288_s30 + $0x20] sm:$0xff] (!%p714_p4)   ;;  %v906_v7 = vld [vmem:[%s1288_s30 + $0x28] sm:$0xff] (!%p714_p4)  }
  0x63   : > { %762 = vmatpush3.bf16.msra.mxu0 (!%p714_p4), %v901_v1  ;;  %v907_v8 = vld [vmem:[%s1288_s30 + $0x30] sm:$0xff] (!%p714_p4)   ;;  %v908_v9 = vld [vmem:[%s1288_s30 + $0x38] sm:$0xff] (!%p714_p4)   ;;  %v434_v11 = vld [vmem:[#allocation2] sm:$0xff] (!%p714_p4) }
  0x64   : > { %763 = vmatprep.subr.bf16.mxu0 (!%p714_p4), %v1090_v2  ;;  %v909_v10 = vld [vmem:[%s256_s11] sm:$0xff] (!%p714_p4)   ;;  %v435_v13 = vld [vmem:[#allocation2 + $0x8] sm:$0xff] (!%p714_p4) }
  0x67   : > { %764 = vmatpush3.bf16.msra.mxu0 (!%p714_p4), %v902_v3 }
  0x68   : > { %765 = vmatprep.subr.bf16.mxu0 (!%p714_p4), %v1090_v2 }
  0x6b   : > { %766 = vmatpush3.bf16.msra.mxu0 %v903_v4 }
  0x6c   : > { %767 = vmatprep.subr.bf16.mxu0 %v1090_v2 }
  0x6f   : > { %768 = vmatpush3.bf16.msra.mxu0 %v904_v5 }
  0x70   : > { %769 = vmatprep.subr.bf16.mxu0 %v1090_v2 }
  0x73   : > { %770 = vmatpush3.bf16.msra.mxu0 %v905_v6 }
  0x74   : > { %771 = vmatprep.subr.bf16.mxu0 %v1090_v2 }
  0x77   : > { %772 = vmatpush3.bf16.msra.mxu0 %v906_v7 }
  0x78   : > { %773 = vmatprep.subr.bf16.mxu0 %v1090_v2 }
  0x7b   : > { %774 = vmatpush3.bf16.msra.mxu0 %v907_v8 }
  0x7c   : > { %775 = vmatprep.subr.bf16.mxu0 %v1090_v2 }
  0x7f   : > { %776 = vmatpush3.bf16.msra.mxu0 %v908_v9 }
  0x82   : > { %778 = vmatmul.mubr.bf16.vlgmr.msra.gmra.mrb[0].mxu0 %v909_v10 }
 0x155   : > { %v427_v12 = vpop.f32.mrb[0].mxu0 }
 0x156   : > { %v436_v14 = vadd.f32 %v434_v11, %v427_v12  ;;  %v779_v15 = vpop.f32.mrb[1].mxu0 }
 0x157   : > { %v430_v16 = vpop.f32.mrb[2].mxu0 }
 0x158   : > { %438 = vst [vmem:[#allocation2] sm:$0xff] %v436_v14  ;;  %v437_v17 = vadd.f32 %v435_v13, %v430_v16  ;;  %v780_v18 = vpop.f32.mrb[3].mxu0 }
 0x15a   : > { %439 = vst [vmem:[#allocation2 + $0x8] sm:$0xff] %v437_v17 }
 0x15b PF: > { %p724_p6 = scmp.ne.s32.totalorder %s1075_s20, 1 }
 0x15c   : > { %v725_v19 = vld [vmem:[%s1377_s3] ss:$0 sm:$0xff] (!%p724_p6) }
 0x15d   : > { %443 = sbr.rel (%p724_p6) target bundleno = 356 (0x164), region = 56  ;;  %451 = vst [vmem:[#allocation8] sm:$0xff] (!%p724_p6), %v725_v19  ;;  %452 = vst [vmem:[#allocation8 + $0x8] sm:$0xff] (!%p724_p6), %v725_v19 }
 0x164 PF: > { %p726_p12 = scmp.lt.s32.totalorder %s1075_s20, 1 }
 0x165   : > { %v910_v20 = vld [vmem:[%s1288_s30] sm:$0xff] (!%p726_p12)   ;;  %v1092_v21 = vmov (!%p726_p12), 0.0   ;;  %v911_v22 = vld [vmem:[%s1288_s30 + $0x8] sm:$0xff] (!%p726_p12)   ;;  %vm1093_vm1 = vmmov (!%p726_p12), 0   ;;  %v912_v23 = vld [vmem:[%s1288_s30 + $0x10] sm:$0xff] (!%p726_p12)   ;;  %s727_s12 = sadd.s32 (!%p726_p12), 4294967295, %s1075_s20 }
 0x166   : > { %456 = sbr.rel (%p726_p12) target bundleno = 607 (0x25f), region = 60  ;;  %781 = vmatprep.subr.bf16.mxu0 (!%p726_p12), %v1092_v21  ;;  %797 = vmatprep.mubr.msk.bf16.mxu0 (!%p726_p12), %vm1093_vm1, %v1092_v21  ;;  %v913_v24 = vld [vmem:[%s1288_s30 + $0x18] sm:$0xff] (!%p726_p12)   ;;  %s728_s18 = sshll.u32 (!%p726_p12), %s727_s12, 4  ;;  %v914_v25 = vld [vmem:[%s1288_s30 + $0x20] sm:$0xff] (!%p726_p12)   ;;  %v915_v26 = vld [vmem:[%s1288_s30 + $0x28] sm:$0xff] (!%p726_p12)  }
 0x167   : > { %782 = vmatpush3.bf16.msra.mxu0 (!%p726_p12), %v910_v20  ;;  %s459_s27 = scalar_lea.vmem (!%p726_p12), [#allocation2], %s728_s18  ;;  %v729_v29 = vld [vmem:[%s1376_s2] ss:$0 sm:$0xff] (!%p726_p12)  ;;  %v916_v32 = vld [vmem:[%s1288_s30 + $0x30] sm:$0xff] (!%p726_p12)   ;;  %v917_v35 = vld [vmem:[%s1288_s30 + $0x38] sm:$0xff] (!%p726_p12)  }
 0x168   : > { %783 = vmatprep.subr.bf16.mxu0 (!%p726_p12), %v1092_v21  ;;  %v460_v27 = vld [vmem:[%s459_s27] sm:$0xff] (!%p726_p12)  ;;  %v461_v28 = vld [vmem:[%s459_s27 + $0x8] sm:$0xff] (!%p726_p12) }
 0x169   : > { %v469_v30 = vadd.f32 (!%p726_p12), %v729_v29, %v460_v27  ;;  %v470_v31 = vadd.f32 (!%p726_p12), %v729_v29, %v461_v28  ;;  %v474_v37 = vld [vmem:[#allocation8] sm:$0xff] (!%p726_p12)  ;;  %v475_v39 = vld [vmem:[#allocation8 + $0x8] sm:$0xff] (!%p726_p12) }
 0x16b   : > { %784 = vmatpush3.bf16.msra.mxu0 (!%p726_p12), %v911_v22  ;;  %v471_v33 = vmax.f32 (!%p726_p12), %v469_v30, 0.0  ;;  %v472_v34 = vmax.f32 (!%p726_p12), %v470_v31, 0.0 }
 0x16c   : > { %785 = vmatprep.subr.bf16.mxu0 (!%p726_p12), %v1092_v21 }
 0x16d   : > { %v473_v36 = vpack.c.bf16 %v472_v34, %v471_v33 }
 0x16f   : > { %786 = vmatpush3.bf16.msra.mxu0 %v912_v23 }
 0x170   : > { %787 = vmatprep.subr.bf16.mxu0 %v1092_v21 }
 0x173   : > { %788 = vmatpush3.bf16.msra.mxu0 %v913_v24 }
 0x174   : > { %789 = vmatprep.subr.bf16.mxu0 %v1092_v21 }
 0x177   : > { %790 = vmatpush3.bf16.msra.mxu0 %v914_v25 }
 0x178   : > { %791 = vmatprep.subr.bf16.mxu0 %v1092_v21 }
 0x17b   : > { %792 = vmatpush3.bf16.msra.mxu0 %v915_v26 }
 0x17c   : > { %793 = vmatprep.subr.bf16.mxu0 %v1092_v21 }
 0x17f   : > { %794 = vmatpush3.bf16.msra.mxu0 %v916_v32 }
 0x180   : > { %795 = vmatprep.subr.bf16.mxu0 %v1092_v21 }
 0x183   : > { %796 = vmatpush3.bf16.msra.mxu0 %v917_v35 }
 0x186   : > { %798 = vmatmul.mubr.bf16.vlgmr.msra.gmra.mrb[0].mxu0 %v473_v36 }
 0x259   : > { %v574_v38 = vpop.f32.mrb[0].mxu0 }
 0x25a   : > { %v581_v40 = vadd.f32 %v574_v38, %v474_v37  ;;  %v799_v41 = vpop.f32.mrb[1].mxu0 }
 0x25b   : > { %v577_v42 = vpop.f32.mrb[2].mxu0 }
 0x25c   : > { %583 = vst [vmem:[#allocation8] sm:$0xff] %v581_v40  ;;  %v582_v43 = vadd.f32 %v577_v42, %v475_v39  ;;  %v800_v44 = vpop.f32.mrb[3].mxu0 }
 0x25e   : > { %584 = vst [vmem:[#allocation8 + $0x8] sm:$0xff] %v582_v43 }
 0x25f PF: > { %p1325_p13 = scmp.eq.s32.totalorder %s694_s23, 1  ;;  %s1094_s6 = smov [#allocation8]  }
 0x260   : > { %s594_s8 = sshll.u32 %s1094_s6, 4  ;;  %s595_s8 = int_to_ptr.vmem [resolvable:$true] %s594_s8 }
 0x261   : > { %s978_s5 = scalar_lea.vmem %s595_s8, 256  ;;  %p985_p2 = scmp.lt.s32.totalorder %s595_s8, %s595_s8 }
 0x262   : > { %p979_p0 = scmp.ne.s32.totalorder %s595_s8, %s978_s5  ;;  %p986_p8 = scmp.lt.s32.totalorder %s978_s5, %s978_s5 }
 0x264   : > { %p980_p3 = pnand %p979_p0, %p1325_p13  ;;  %p987_p10 = por %p986_p8, %p985_p2 }
 0x266   : > { %p981_p9 = pneg %p980_p3 }
 0x268   : > { %p988_p11 = pnand %p987_p10, %p981_p9 }
 0x26a   : > { %991 = shalt.err (!%p988_p11)
}
 0x26b   : > { %s992_s23 = scalar_lea.hbm %s1378_s4, 256 }
 0x26c   : > { %p993_p1 = scmp.ne.s32.totalorder %s1378_s4, %s992_s23  ;;  %p998_p4 = scmp.lt.u32.totalorder %s992_s23, %s1378_s4 }
 0x26e   : > { %p994_p7 = pnand %p993_p1, %p1325_p13 }
 0x270   : > { %p995_p5 = pneg %p994_p7 }
 0x272   : > { %p1000_p6 = pnand %p998_p4, %p995_p5 }
 0x274   : > { %1003 = shalt.err (!%p1000_p6)
}
 0x275   : > { %s1095_s30 = smov 128   ;;  %s1096_s26 = smov 8  }
 0x276   : > { %806 = dma.vmem_to_hbm [thread:$0]  (%p1325_p13), %s595_s8, 256, %s1378_s4, [#allocation5], %s1095_s30, %s1095_s30, %s1096_s26  }
 0x277   : > { %1049 = dma.done.wait (%p1325_p13), [#allocation5], 256  }
 0x278   : > { %1051 = vsyncadd (%p1325_p13), [#allocation5], 4294967040 }
 0x279 PF: > { %s21_s22 = sadd.s32 1, %s1083_s22   ;;  %s1398_s15 = smov %s1059_s16 }
 0x27a   : > { %p18_p12 = scmp.ge.s32.totalorder %s21_s22, 4   ;;  %s1399_s16 = smov %s1063_s17 }
 0x27b   : > { %s1400_s17 = smov %s1221_s29  ;;  %s1401_s18 = smov %s1071_s19 }
 0x27c   : > { %s1364_s19 = smov 0   ;;  %s1402_s20 = smov %s1079_s21 }
 0x27d   : > { %s1403_s21 = smov %s1405_s24  ;;  %20 = sbr.rel (!%p18_p12) target bundleno = 8 (0x8), region = 107 }
 0x284   :  { %610 = vsyncpa [#allocation4], 1 }
 0x285   :  { %612 = vsyncpa [#allocation4 + $0x1], 1 }
 0x286   :  { %613 = vsyncpa [#allocation7], 1 }
 0x287   :  { %615 = vsyncpa [#allocation7 + $0x1], 1 }
 0x288   :  { %616 = vsyncpa [#allocation5], 1 }
 0x289   :  { %618 = vsyncpa [#allocation5 + $0x1], 1 }

</bundles_post_ra>
